<compile_context>
chip_gen: v7x
topology: tpu7x:2x2x1
jax: 0.10.0
libtpu: 0.0.40
codegen_flags: <defaults>
</compile_context>

<pallas_src>
from functools import partial

import numpy as np
import jax
import jax.numpy as jnp
from jax.experimental import pallas as pl
from jax.experimental.pallas import tpu as pltpu


def _round_up(n, m):
    return -(-n // m) * m


def topk_gating_kernel(x_ref, w1_ref, b1_ref, w2_ref, b2_ref, out_ref, *, num_experts):
    # x: (TB, D) bf16 | w1: (D, Hp) bf16 | b1: (1, Hp) f32
    # w2: (Hp, Ep) bf16 | b2: (1, Ep) f32 (padded experts carry -1e30)
    # out: (TB, 128) f32 slab -- lane0=p1, lane1=p2, lane2=i1, lane3=i2.
    x = x_ref[...]

    # Layer 1: Linear + ReLU (bf16 MXU operands, f32 accumulate).
    h = jnp.dot(x, w1_ref[...], preferred_element_type=jnp.float32) + b1_ref[...]
    h = jnp.maximum(h, 0.0)                                            # (TB, Hp) f32

    # Layer 2: Linear (bf16 MXU operands, f32 accumulate).
    scores = jnp.dot(h.astype(jnp.bfloat16), w2_ref[...],
                     preferred_element_type=jnp.float32) + b2_ref[...]  # (TB, Ep) f32

    # Softmax pieces; padded experts have score ~-1e30 -> exp == 0 exactly.
    m = jnp.max(scores, axis=1, keepdims=True)
    e = jnp.exp(scores - m)                                            # (TB, Ep) f32
    denom = jnp.sum(e, axis=1, keepdims=True)
    rinv = pl.reciprocal(denom, approx=False)                          # (TB, 1)

    # Top-2 on the softmax numerator (exp is monotone => same ranking as probs).
    # First-occurrence (lowest-index) tie-break, like torch.topk. Padded lanes
    # forced to -1 so they can never tie with an underflowed-to-zero real expert.
    Ep = e.shape[1]
    lane = jax.lax.broadcasted_iota(jnp.int32, e.shape, 1)
    e_tk = jnp.where(lane < num_experts, e, -1.0)
    e1 = jnp.max(e_tk, axis=1, keepdims=True)
    i1 = jnp.min(jnp.where(e_tk == e1, lane, Ep), axis=1, keepdims=True)
    e_m = jnp.where(lane == i1, -1.0, e_tk)
    e2 = jnp.max(e_m, axis=1, keepdims=True)
    i2 = jnp.min(jnp.where(e_m == e2, lane, Ep), axis=1, keepdims=True)

    p1 = e1 * rinv                                                     # (TB, 1)
    p2 = e2 * rinv

    # Single lane-dense (TB, 128) f32 output slab (unmasked vector stores).
    # Indices < 128 are exactly representable in f32; wrapper casts them back.
    out_lane = jax.lax.broadcasted_iota(jnp.int32, out_ref.shape, 1)
    out_ref[...] = jnp.where(
        out_lane == 0, p1,
        jnp.where(out_lane == 1, p2,
                  jnp.where(out_lane == 2, i1.astype(jnp.float32),
                            jnp.where(out_lane == 3, i2.astype(jnp.float32), 0.0))))


def topk_gating(x, w1, b1, w2, b2, *, block_tokens=1024):
    """x:(B,D) f32, w1:(D,H), b1:(H,), w2:(H,E), b2:(E,) -> (idx (B,2) i32, prob (B,2) f32)."""
    B, D = x.shape
    H = w1.shape[1]
    E = w2.shape[1]
    Hp = _round_up(H, 128)     # lane-dense hidden dim (zero padded)
    Ep = _round_up(E, 128)     # lane-dense expert dim (padded experts masked to -1e30)
    OUT_W = 128                # lane-dense output slab width

    # One-time weight prep (outside the kernel): bf16 MXU operands + padding.
    w1p = jnp.zeros((D, Hp), jnp.bfloat16).at[:, :H].set(w1.astype(jnp.bfloat16))
    b1p = jnp.zeros((1, Hp), jnp.float32).at[0, :H].set(b1.astype(jnp.float32))
    w2p = jnp.zeros((Hp, Ep), jnp.bfloat16).at[:H, :E].set(w2.astype(jnp.bfloat16))
    b2p = jnp.full((1, Ep), -1e30, jnp.float32).at[0, :E].set(b2.astype(jnp.float32))

    # bf16 activation read halves HBM traffic (kernel is memory-bound on x).
    xb = x.astype(jnp.bfloat16)

    # Token block: sublane-aligned (multiple of 8), capped at block_tokens.
    tb = min(block_tokens, _round_up(B, 8))
    Bp = _round_up(B, tb)
    if Bp != B:
        xb = jnp.zeros((Bp, D), jnp.bfloat16).at[:B].set(xb)

    slab = pl.pallas_call(
        partial(topk_gating_kernel, num_experts=E),
        out_shape=jax.ShapeDtypeStruct((Bp, OUT_W), jnp.float32),
        grid=(pl.cdiv(Bp, tb),),
        in_specs=[
            pl.BlockSpec((tb, D), lambda i: (i, 0)),    # x: tiled over tokens
            pl.BlockSpec((D, Hp), lambda i: (0, 0)),    # weights/biases stay resident
            pl.BlockSpec((1, Hp), lambda i: (0, 0)),
            pl.BlockSpec((Hp, Ep), lambda i: (0, 0)),
            pl.BlockSpec((1, Ep), lambda i: (0, 0)),
        ],
        out_specs=pl.BlockSpec((tb, OUT_W), lambda i: (i, 0)),
        compiler_params=pltpu.CompilerParams(
            dimension_semantics=("parallel",)),
    )(xb, w1p, b1p, w2p, b2p)

    # Wrapper-side split of the lane-dense slab (free layout plumbing).
    prob = slab[:B, 0:2]
    idx = slab[:B, 2:4].astype(jnp.int32)
    return idx, prob


def _kaiming_uniform_relu(key, fan_in, shape):
    # torch.nn.init.kaiming_uniform_(nonlinearity='relu'): bound = sqrt(2)*sqrt(3/fan_in)
    bound = np.sqrt(2.0) * np.sqrt(3.0 / fan_in)
    return jax.random.uniform(key, shape, jnp.float32, -bound, bound)


def _linear_bias(key, fan_in, shape):
    bound = 1.0 / np.sqrt(fan_in)
    return jax.random.uniform(key, shape, jnp.float32, -bound, bound)


if __name__ == "__main__":
    # Small shapes consistent with the module (input_dim=768, hidden 64, E experts).
    B, D, H, E = 16, 768, 64, 8

    key = jax.random.PRNGKey(0)
    kx, kw1, kb1, kw2, kb2 = jax.random.split(key, 5)

    x = jax.random.normal(kx, (B, D), jnp.float32)
    # Stored already transposed: (in, out).
    w1 = _kaiming_uniform_relu(kw1, D, (D, H))
    b1 = _linear_bias(kb1, D, (H,))
    w2 = _kaiming_uniform_relu(kw2, H, (H, E))
    b2 = _linear_bias(kb2, H, (E,))

    idx, prob = jax.block_until_ready(topk_gating(x, w1, b1, w2, b2))

    # Pure-JAX reference using the same bf16 operand / f32 accumulate numerics.
    xb = x.astype(jnp.bfloat16)
    h_ref = jnp.maximum(
        jnp.dot(xb, w1.astype(jnp.bfloat16), preferred_element_type=jnp.float32) + b1, 0.0)
    s_ref = jnp.dot(h_ref.astype(jnp.bfloat16), w2.astype(jnp.bfloat16),
                    preferred_element_type=jnp.float32) + b2
    probs_ref = jax.nn.softmax(s_ref, axis=1)
    p_ref, i_ref = jax.lax.top_k(probs_ref, 2)

    assert np.allclose(np.asarray(prob), np.asarray(p_ref), rtol=2e-3, atol=2e-3)

    idx_np, i_ref_np = np.asarray(idx), np.asarray(i_ref)
    if not np.array_equal(idx_np, i_ref_np):
        # Allow index flips only on numerically tied probabilities.
        pr = np.asarray(probs_ref)
        rows = np.arange(B)[:, None]
        assert np.allclose(pr[rows, idx_np], pr[rows, i_ref_np], rtol=1e-3, atol=1e-3)

    print("KERNEL_OK")
</pallas_src>

<mosaic_0001>
module attributes {stable_mosaic.version = 11 : i64} {
  func.func @topk_gating_kernel(%arg0: i32, %arg1: memref<16x768xbf16, #tpu.memory_space<vmem>>, %arg2: memref<768x128xbf16, #tpu.memory_space<vmem>>, %arg3: memref<1x128xf32, #tpu.memory_space<vmem>>, %arg4: memref<128x128xbf16, #tpu.memory_space<vmem>>, %arg5: memref<1x128xf32, #tpu.memory_space<vmem>>, %arg6: memref<16x128xf32, #tpu.memory_space<vmem>>) attributes {dimension_semantics = [#tpu.dimension_semantics<parallel>], iteration_bounds = array<i64: 1>, scalar_prefetch = 0 : i64, scratch_operands = 0 : i64, tpu.core_type = #tpu.core_type<tc>, window_params = [{transform_indices = @transform_0, window_bounds = array<i64: 16, 768>}, {pipeline_mode = #tpu.pipeline_mode<synchronous>, transform_indices = @transform_1, window_bounds = array<i64: 768, 128>}, {pipeline_mode = #tpu.pipeline_mode<synchronous>, transform_indices = @transform_2, window_bounds = array<i64: 1, 128>}, {pipeline_mode = #tpu.pipeline_mode<synchronous>, transform_indices = @transform_3, window_bounds = array<i64: 128, 128>}, {pipeline_mode = #tpu.pipeline_mode<synchronous>, transform_indices = @transform_4, window_bounds = array<i64: 1, 128>}, {transform_indices = @transform_5, window_bounds = array<i64: 16, 128>}]} {
    %c0 = arith.constant 0 : index
    %c0_0 = arith.constant 0 : index
    %0 = vector.load %arg1[%c0, %c0_0] : memref<16x768xbf16, #tpu.memory_space<vmem>>, vector<16x768xbf16>
    %c0_1 = arith.constant 0 : index
    %c0_2 = arith.constant 0 : index
    %1 = vector.load %arg2[%c0_1, %c0_2] : memref<768x128xbf16, #tpu.memory_space<vmem>>, vector<768x128xbf16>
    %cst = arith.constant dense<0.000000e+00> : vector<16x128xf32>
    %2 = tpu.matmul %0, %1, %cst {dimension_numbers = #tpu.dot_dimension_numbers<[1], [0], [0], [1], [0, 0, 1, 1], [], []>} : vector<16x768xbf16>, vector<768x128xbf16>, vector<16x128xf32> -> vector<16x128xf32>
    %c0_3 = arith.constant 0 : index
    %c0_4 = arith.constant 0 : index
    %3 = vector.load %arg3[%c0_3, %c0_4] : memref<1x128xf32, #tpu.memory_space<vmem>>, vector<1x128xf32>
    %4 = vector.broadcast %3 : vector<1x128xf32> to vector<16x128xf32>
    %5 = arith.addf %2, %4 : vector<16x128xf32>
    %cst_5 = arith.constant 0.000000e+00 : f32
    %6 = vector.broadcast %cst_5 : f32 to vector<16x128xf32>
    %7 = arith.maximumf %5, %6 : vector<16x128xf32>
    %8 = arith.truncf %7 : vector<16x128xf32> to vector<16x128xbf16>
    %c0_6 = arith.constant 0 : index
    %c0_7 = arith.constant 0 : index
    %9 = vector.load %arg4[%c0_6, %c0_7] : memref<128x128xbf16, #tpu.memory_space<vmem>>, vector<128x128xbf16>
    %cst_8 = arith.constant dense<0.000000e+00> : vector<16x128xf32>
    %10 = tpu.matmul %8, %9, %cst_8 {dimension_numbers = #tpu.dot_dimension_numbers<[1], [0], [0], [1], [0, 0, 1, 1], [], []>} : vector<16x128xbf16>, vector<128x128xbf16>, vector<16x128xf32> -> vector<16x128xf32>
    %c0_9 = arith.constant 0 : index
    %c0_10 = arith.constant 0 : index
    %11 = vector.load %arg5[%c0_9, %c0_10] : memref<1x128xf32, #tpu.memory_space<vmem>>, vector<1x128xf32>
    %12 = vector.broadcast %11 : vector<1x128xf32> to vector<16x128xf32>
    %13 = arith.addf %10, %12 : vector<16x128xf32>
    %cst_11 = arith.constant dense<0xFF800000> : vector<16xf32>
    %14 = vector.multi_reduction <maximumf>, %13, %cst_11 [1] : vector<16x128xf32> to vector<16xf32>
    %15 = vector.shape_cast %14 : vector<16xf32> to vector<16x1xf32>
    %16 = vector.broadcast %15 : vector<16x1xf32> to vector<16x128xf32>
    %17 = arith.subf %13, %16 : vector<16x128xf32>
    %18 = math.exp %17 : vector<16x128xf32>
    %cst_12 = arith.constant dense<0.000000e+00> : vector<16xf32>
    %19 = vector.multi_reduction <add>, %18, %cst_12 [1] : vector<16x128xf32> to vector<16xf32>
    %20 = vector.shape_cast %19 : vector<16xf32> to vector<16x1xf32>
    %21 = tpu.reciprocal %20 : vector<16x1xf32> -> vector<16x1xf32>
    %22 = tpu.iota {dimensions = array<i32: 1>} : vector<16x128xi32>
    %c8_i32 = arith.constant 8 : i32
    %23 = vector.broadcast %c8_i32 : i32 to vector<16x128xi32>
    %24 = arith.cmpi slt, %22, %23 : vector<16x128xi32>
    %cst_13 = arith.constant -1.000000e+00 : f32
    %25 = vector.broadcast %cst_13 : f32 to vector<16x128xf32>
    %26 = arith.select %24, %18, %25 : vector<16x128xi1>, vector<16x128xf32>
    %cst_14 = arith.constant dense<0xFF800000> : vector<16xf32>
    %27 = vector.multi_reduction <maximumf>, %26, %cst_14 [1] : vector<16x128xf32> to vector<16xf32>
    %28 = vector.shape_cast %27 : vector<16xf32> to vector<16x1xf32>
    %29 = vector.broadcast %28 : vector<16x1xf32> to vector<16x128xf32>
    %30 = arith.cmpf oeq, %26, %29 : vector<16x128xf32>
    %c128_i32 = arith.constant 128 : i32
    %31 = vector.broadcast %c128_i32 : i32 to vector<16x128xi32>
    %32 = arith.select %30, %22, %31 : vector<16x128xi1>, vector<16x128xi32>
    %cst_15 = arith.constant dense<2147483647> : vector<16xi32>
    %33 = vector.multi_reduction <minsi>, %32, %cst_15 [1] : vector<16x128xi32> to vector<16xi32>
    %34 = vector.shape_cast %33 : vector<16xi32> to vector<16x1xi32>
    %35 = vector.broadcast %34 : vector<16x1xi32> to vector<16x128xi32>
    %36 = arith.cmpi eq, %22, %35 : vector<16x128xi32>
    %cst_16 = arith.constant -1.000000e+00 : f32
    %37 = vector.broadcast %cst_16 : f32 to vector<16x128xf32>
    %38 = arith.select %36, %37, %26 : vector<16x128xi1>, vector<16x128xf32>
    %cst_17 = arith.constant dense<0xFF800000> : vector<16xf32>
    %39 = vector.multi_reduction <maximumf>, %38, %cst_17 [1] : vector<16x128xf32> to vector<16xf32>
    %40 = vector.shape_cast %39 : vector<16xf32> to vector<16x1xf32>
    %41 = vector.broadcast %40 : vector<16x1xf32> to vector<16x128xf32>
    %42 = arith.cmpf oeq, %38, %41 : vector<16x128xf32>
    %c128_i32_18 = arith.constant 128 : i32
    %43 = vector.broadcast %c128_i32_18 : i32 to vector<16x128xi32>
    %44 = arith.select %42, %22, %43 : vector<16x128xi1>, vector<16x128xi32>
    %cst_19 = arith.constant dense<2147483647> : vector<16xi32>
    %45 = vector.multi_reduction <minsi>, %44, %cst_19 [1] : vector<16x128xi32> to vector<16xi32>
    %46 = vector.shape_cast %45 : vector<16xi32> to vector<16x1xi32>
    %47 = arith.mulf %28, %21 : vector<16x1xf32>
    %48 = arith.mulf %40, %21 : vector<16x1xf32>
    %49 = tpu.iota {dimensions = array<i32: 1>} : vector<16x128xi32>
    %c0_i32 = arith.constant 0 : i32
    %50 = vector.broadcast %c0_i32 : i32 to vector<16x128xi32>
    %51 = arith.cmpi eq, %49, %50 : vector<16x128xi32>
    %c1_i32 = arith.constant 1 : i32
    %52 = vector.broadcast %c1_i32 : i32 to vector<16x128xi32>
    %53 = arith.cmpi eq, %49, %52 : vector<16x128xi32>
    %c2_i32 = arith.constant 2 : i32
    %54 = vector.broadcast %c2_i32 : i32 to vector<16x128xi32>
    %55 = arith.cmpi eq, %49, %54 : vector<16x128xi32>
    %56 = arith.sitofp %34 : vector<16x1xi32> to vector<16x1xf32>
    %c3_i32 = arith.constant 3 : i32
    %57 = vector.broadcast %c3_i32 : i32 to vector<16x128xi32>
    %58 = arith.cmpi eq, %49, %57 : vector<16x128xi32>
    %59 = arith.sitofp %46 : vector<16x1xi32> to vector<16x1xf32>
    %cst_20 = arith.constant 0.000000e+00 : f32
    %60 = vector.shape_cast %59 : vector<16x1xf32> to vector<16x1xf32>
    %61 = vector.broadcast %60 : vector<16x1xf32> to vector<16x128xf32>
    %62 = vector.broadcast %cst_20 : f32 to vector<16x128xf32>
    %63 = arith.select %58, %61, %62 : vector<16x128xi1>, vector<16x128xf32>
    %64 = vector.shape_cast %56 : vector<16x1xf32> to vector<16x1xf32>
    %65 = vector.broadcast %64 : vector<16x1xf32> to vector<16x128xf32>
    %66 = arith.select %55, %65, %63 : vector<16x128xi1>, vector<16x128xf32>
    %67 = vector.shape_cast %48 : vector<16x1xf32> to vector<16x1xf32>
    %68 = vector.broadcast %67 : vector<16x1xf32> to vector<16x128xf32>
    %69 = arith.select %53, %68, %66 : vector<16x128xi1>, vector<16x128xf32>
    %70 = vector.shape_cast %47 : vector<16x1xf32> to vector<16x1xf32>
    %71 = vector.broadcast %70 : vector<16x1xf32> to vector<16x128xf32>
    %72 = arith.select %51, %71, %69 : vector<16x128xi1>, vector<16x128xf32>
    %c0_21 = arith.constant 0 : index
    %c0_22 = arith.constant 0 : index
    %73 = vector.load %arg6[%c0_21, %c0_22] : memref<16x128xf32, #tpu.memory_space<vmem>>, vector<16x128xf32>
    tpu.vector_store %arg6[%c0_21, %c0_22], %72 {strides = array<i32>} : memref<16x128xf32, #tpu.memory_space<vmem>>, vector<16x128xf32>,
    return
  }
  func.func @transform_0(%arg0: i32) -> (i32, i32) {
    %c0_i32 = arith.constant 0 : i32
    %c0_i32_0 = arith.constant 0 : i32
    return %arg0, %c0_i32 : i32, i32
  }
  func.func @transform_1(%arg0: i32) -> (i32, i32) {
    %c0_i32 = arith.constant 0 : i32
    %c0_i32_0 = arith.constant 0 : i32
    %c0_i32_1 = arith.constant 0 : i32
    return %c0_i32, %c0_i32_0 : i32, i32
  }
  func.func @transform_2(%arg0: i32) -> (i32, i32) {
    %c0_i32 = arith.constant 0 : i32
    %c0_i32_0 = arith.constant 0 : i32
    %c0_i32_1 = arith.constant 0 : i32
    return %c0_i32, %c0_i32_0 : i32, i32
  }
  func.func @transform_3(%arg0: i32) -> (i32, i32) {
    %c0_i32 = arith.constant 0 : i32
    %c0_i32_0 = arith.constant 0 : i32
    %c0_i32_1 = arith.constant 0 : i32
    return %c0_i32, %c0_i32_0 : i32, i32
  }
  func.func @transform_4(%arg0: i32) -> (i32, i32) {
    %c0_i32 = arith.constant 0 : i32
    %c0_i32_0 = arith.constant 0 : i32
    %c0_i32_1 = arith.constant 0 : i32
    return %c0_i32, %c0_i32_0 : i32, i32
  }
  func.func @transform_5(%arg0: i32) -> (i32, i32) {
    %c0_i32 = arith.constant 0 : i32
    %c0_i32_0 = arith.constant 0 : i32
    return %arg0, %c0_i32 : i32, i32
  }
}

</mosaic_0001>

<bundles_post_ra>
// kernel: tpu_custom_call.1
= control target key start
LH: loop header
LB: loop body
LE: loop exit
PB: predicated region body
PF: predicated region fallthrough
CT: control target
= control target key end

     0   :  { %10 = vsyncpa [#allocation3], 0  ;;  %s1350_s0 = inlined_call_operand.hbm [shape: bf16[16,768], index: 0, kind: input, shape index: {}]   ;;  %s1351_s1 = inlined_call_operand.hbm [shape: bf16[768,128], index: 1, kind: input, shape index: {}]   ;;  %s1352_s2 = inlined_call_operand.vmem [shape: f32[1,128], index: 2, kind: input, shape index: {}]   ;;  %s1353_s3 = inlined_call_operand.hbm [shape: bf16[128,128], index: 3, kind: input, shape index: {}]   ;;  %s1354_s4 = inlined_call_operand.vmem [shape: f32[1,128], index: 4, kind: input, shape index: {}]   ;;  %s1355_s5 = inlined_call_operand.hbm [shape: f32[16,128], index: 5, kind: output, shape index: {}]  }
   0x1   :  { %11 = vsyncpa [#allocation6], 0 }
   0x2   :  { %12 = vsyncpa [#allocation4], 0  ;;  %s1203_s18 = smov [#allocation5]   ;;  %s1109_s22 = scalar_lea.hbm %s1351_s1, 6144 }
   0x3   :  { %s30_s19 = sshll.u32 %s1203_s18, 4  ;;  %p1110_p0 = scmp.ne.s32.totalorder %s1351_s1, %s1109_s22  ;;  %s31_s19 = int_to_ptr.vmem [resolvable:$true] %s30_s19 }
   0x4   :  { %p1113_p1 = scmp.lt.u32.totalorder %s1109_s22, %s1351_s1 }
   0x6   :  { %p1115_p2 = pnand %p1113_p1, %p1110_p0 }
   0x8   :  { %1118 = shalt.err (!%p1115_p2)
}
   0x9   :  { %s1119_s27 = scalar_lea.vmem %s31_s19, 6144  ;;  %p1124_p4 = scmp.lt.s32.totalorder %s31_s19, %s31_s19 }
   0xa   :  { %p1120_p3 = scmp.ne.s32.totalorder %s31_s19, %s1119_s27  ;;  %p1125_p5 = scmp.lt.s32.totalorder %s1119_s27, %s1119_s27 }
   0xc   :  { %p1126_p6 = por %p1125_p5, %p1124_p4 }
   0xe   :  { %p1127_p7 = pnand %p1126_p6, %p1120_p3 }
  0x10   :  { %1130 = shalt.err (!%p1127_p7)
}
  0x11   :  { %s1204_s28 = smov 64   ;;  %s1205_s29 = smov 4  }
  0x12   :  { %36 = dma.hbm_to_vmem [thread:$0]  %s1351_s1, 6144, %s31_s19, [#allocation6], %s1204_s28, %s1204_s28, %s1205_s29  }
  0x13   :  { %s1206_s7 = smov [#allocation2]   ;;  %s1131_s11 = scalar_lea.hbm %s1350_s0, 768 }
  0x14   :  { %s18_s8 = sshll.u32 %s1206_s7, 4  ;;  %p1132_p8 = scmp.ne.s32.totalorder %s1350_s0, %s1131_s11  ;;  %s19_s8 = int_to_ptr.vmem [resolvable:$true] %s18_s8 }
  0x15   :  { %p1135_p9 = scmp.lt.u32.totalorder %s1131_s11, %s1350_s0 }
  0x17   :  { %p1137_p10 = pnand %p1135_p9, %p1132_p8 }
  0x19   :  { %1140 = shalt.err (!%p1137_p10)
}
  0x1a   :  { %s1141_s16 = scalar_lea.vmem %s19_s8, 768  ;;  %p1146_p12 = scmp.lt.s32.totalorder %s19_s8, %s19_s8 }
  0x1b   :  { %p1142_p11 = scmp.ne.s32.totalorder %s19_s8, %s1141_s16  ;;  %p1147_p13 = scmp.lt.s32.totalorder %s1141_s16, %s1141_s16 }
  0x1d   :  { %p1148_p0 = por %p1147_p13, %p1146_p12 }
  0x1f   :  { %p1149_p1 = pnand %p1148_p0, %p1142_p11 }
  0x21   :  { %1152 = shalt.err (!%p1149_p1)
}
  0x22   :  { %s1207_s1 = smov 384   ;;  %s1208_s17 = smov 24  }
  0x23   :  { %24 = dma.hbm_to_vmem [thread:$0]  %s1350_s0, 768, %s19_s8, [#allocation3], %s1207_s1, %s1207_s1, %s1208_s17  }
  0x24   :  { %s1209_s20 = smov [#allocation7]   ;;  %s1153_s24 = scalar_lea.hbm %s1353_s3, 1024 }
  0x25   :  { %s44_s21 = sshll.u32 %s1209_s20, 4  ;;  %p1154_p2 = scmp.ne.s32.totalorder %s1353_s3, %s1153_s24  ;;  %s45_s21 = int_to_ptr.vmem [resolvable:$true] %s44_s21 }
  0x26   :  { %p1157_p3 = scmp.lt.u32.totalorder %s1153_s24, %s1353_s3 }
  0x28   :  { %p1159_p4 = pnand %p1157_p3, %p1154_p2 }
  0x2a   :  { %1162 = shalt.err (!%p1159_p4)
}
  0x2b   :  { %s1163_s6 = scalar_lea.vmem %s45_s21, 1024  ;;  %p1168_p6 = scmp.lt.s32.totalorder %s45_s21, %s45_s21 }
  0x2c   :  { %p1164_p5 = scmp.ne.s32.totalorder %s45_s21, %s1163_s6  ;;  %p1169_p7 = scmp.lt.s32.totalorder %s1163_s6, %s1163_s6 }
  0x2e   :  { %p1170_p8 = por %p1169_p7, %p1168_p6 }
  0x30   :  { %p1171_p9 = pnand %p1170_p8, %p1164_p5 }
  0x32   :  { %1174 = shalt.err (!%p1171_p9)
}
  0x33   :  { %50 = dma.hbm_to_vmem [thread:$0]  %s1353_s3, 1024, %s45_s21, [#allocation6], %s1204_s28, %s1204_s28, %s1205_s29  }
  0x34   :  { %1197 = dma.done.wait [#allocation3], 768  }
  0x35   :  { %1198 = vsyncadd [#allocation3], 4294966528 }
  0x36   :  { %1199 = dma.done.wait [#allocation6], 7168  }
  0x37   :  { %1200 = vsyncadd [#allocation6], 4294960128  ;;  %v1036_v0 = vld [vmem:[#allocation5 + $0x40] sm:$0xff]   ;;  %v1040_v4 = vld [vmem:[#allocation5 + $0x48] sm:$0xff]   ;;  %v1210_v55 = vmov 0.0   ;;  %vm1211_vm0 = vmmov 0  }
  0x38   :  { %v1037_v1 = vld [vmem:[#allocation5] sm:$0xff]   ;;  %929 = vmatprep.subr.bf16.mxu0 %v1036_v0  ;;  %v1041_v5 = vld [vmem:[#allocation5 + $0x8] sm:$0xff]   ;;  %v1044_v8 = vld [vmem:[#allocation5 + $0x50] sm:$0xff]  }
  0x39   :  { %v1038_v2 = vld [vmem:[#allocation5 + $0xc0] sm:$0xff]   ;;  %930 = vmatpush3.bf16.msra.mxu0 %v1037_v1  ;;  %v1042_v6 = vld [vmem:[#allocation5 + $0xc8] sm:$0xff]   ;;  %v1045_v9 = vld [vmem:[#allocation5 + $0x10] sm:$0xff]  }
  0x3a   :  { %v1039_v3 = vld [vmem:[#allocation5 + $0x80] sm:$0xff]   ;;  %951 = vmatprep.subr.bf16.mxu1 %v1038_v2  ;;  %931 = vmatprep.subr.bf16.mxu0 %v1040_v4  ;;  %v1043_v7 = vld [vmem:[#allocation5 + $0x88] sm:$0xff]   ;;  %v1046_v10 = vld [vmem:[#allocation5 + $0xd0] sm:$0xff]  }
  0x3b   :  { %952 = vmatpush3.bf16.msra.mxu1 %v1039_v3  ;;  %v1047_v11 = vld [vmem:[#allocation5 + $0x90] sm:$0xff]   ;;  %v1048_v12 = vld [vmem:[#allocation5 + $0x58] sm:$0xff]   ;;  %v1052_v16 = vld [vmem:[#allocation5 + $0x60] sm:$0xff]  }
  0x3c   :  { %953 = vmatprep.subr.bf16.mxu1 %v1042_v6  ;;  %v1049_v13 = vld [vmem:[#allocation5 + $0x18] sm:$0xff]   ;;  %v1053_v17 = vld [vmem:[#allocation5 + $0x20] sm:$0xff]   ;;  %v1056_v20 = vld [vmem:[#allocation5 + $0x68] sm:$0xff]  }
  0x3d   :  { %932 = vmatpush3.bf16.msra.mxu0 %v1041_v5  ;;  %v1050_v14 = vld [vmem:[#allocation5 + $0xd8] sm:$0xff]   ;;  %v1054_v18 = vld [vmem:[#allocation5 + $0xe0] sm:$0xff]   ;;  %v1057_v21 = vld [vmem:[#allocation5 + $0x28] sm:$0xff]  }
  0x3e   :  { %933 = vmatprep.subr.bf16.mxu0 %v1044_v8  ;;  %v1051_v15 = vld [vmem:[#allocation5 + $0x98] sm:$0xff]   ;;  %v1055_v19 = vld [vmem:[#allocation5 + $0xa0] sm:$0xff]   ;;  %v1058_v22 = vld [vmem:[#allocation5 + $0xe8] sm:$0xff]  }
  0x3f   :  { %954 = vmatpush3.bf16.msra.mxu1 %v1043_v7  ;;  %v1059_v23 = vld [vmem:[#allocation5 + $0xa8] sm:$0xff]   ;;  %v1060_v24 = vld [vmem:[#allocation5 + $0x70] sm:$0xff]   ;;  %v1064_v28 = vld [vmem:[#allocation5 + $0x78] sm:$0xff]  }
  0x40   :  { %955 = vmatprep.subr.bf16.mxu1 %v1046_v10  ;;  %v1061_v25 = vld [vmem:[#allocation5 + $0x30] sm:$0xff]   ;;  %v1065_v29 = vld [vmem:[#allocation5 + $0x38] sm:$0xff]   ;;  %v1071_v34 = vld [vmem:[#allocation5 + $0x140] sm:$0xff]  }
  0x41   :  { %934 = vmatpush3.bf16.msra.mxu0 %v1045_v9  ;;  %v1062_v26 = vld [vmem:[#allocation5 + $0xf0] sm:$0xff]   ;;  %v1066_v30 = vld [vmem:[#allocation5 + $0xf8] sm:$0xff]   ;;  %v1075_v37 = vld [vmem:[#allocation5 + $0x100] sm:$0xff]  }
  0x42   :  { %935 = vmatprep.subr.bf16.mxu0 %v1048_v12  ;;  %v1063_v27 = vld [vmem:[#allocation5 + $0xb0] sm:$0xff]   ;;  %v1070_v33 = vld [vmem:[#allocation5 + $0xb8] sm:$0xff]   ;;  %v1076_v38 = vld [vmem:[#allocation5 + $0x148] sm:$0xff]  }
  0x43   :  { %956 = vmatpush3.bf16.msra.mxu1 %v1047_v11  ;;  %v1067_v31 = vld [vmem:[#allocation2] ss:$24 sps:$4 sm:$0xff]   ;;  %v1069_v32 = vld [vmem:[#allocation2 + $0x4] ss:$24 sps:$4 sm:$0xff]   ;;  %v1080_v42 = vld [vmem:[#allocation5 + $0x158] sm:$0xff]  }
  0x44   :  { %957 = vmatprep.subr.bf16.mxu1 %v1050_v14  ;;  %522 = vmatprep.mubr.bf16.mxu0 %v1069_v32  ;;  %v1072_v35 = vld [vmem:[#allocation2 + $0x8] ss:$24 sps:$4 sm:$0xff]   ;;  %v1074_v36 = vld [vmem:[#allocation2 + $0xc] ss:$24 sps:$4 sm:$0xff]   ;;  %v1077_v39 = vld [vmem:[#allocation5 + $0x108] sm:$0xff]  }
  0x45   :  { %936 = vmatpush3.bf16.msra.mxu0 %v1049_v13  ;;  %563 = vmatprep.mubr.bf16.mxu1 %v1074_v36  ;;  %v1078_v40 = vld [vmem:[#allocation5 + $0x150] sm:$0xff]   ;;  %v1081_v43 = vld [vmem:[#allocation5 + $0x118] sm:$0xff]   ;;  %v1082_v44 = vld [vmem:[#allocation5 + $0x160] sm:$0xff]  }
  0x46   :  { %937 = vmatprep.subr.bf16.mxu0 %v1052_v16  ;;  %v1079_v41 = vld [vmem:[#allocation5 + $0x110] sm:$0xff]   ;;  %v1083_v45 = vld [vmem:[#allocation5 + $0x120] sm:$0xff]   ;;  %v1084_v46 = vld [vmem:[#allocation5 + $0x168] sm:$0xff]  }
  0x47   :  { %958 = vmatpush3.bf16.msra.mxu1 %v1051_v15  ;;  %v1092_v47 = vld [vmem:[#allocation2 + $0x14] ss:$24 sps:$4 sm:$0xff]   ;;  %v1085_v48 = vld [vmem:[#allocation5 + $0x128] sm:$0xff]   ;;  %v1086_v49 = vld [vmem:[#allocation5 + $0x170] sm:$0xff]  }
  0x48   :  { %959 = vmatprep.subr.bf16.mxu1 %v1054_v18  ;;  %v1087_v50 = vld [vmem:[#allocation5 + $0x130] sm:$0xff]   ;;  %v1088_v51 = vld [vmem:[#allocation5 + $0x178] sm:$0xff]   ;;  %v1093_v54 = vld [vmem:[#allocation7] sm:$0xff]  }
  0x49   :  { %938 = vmatpush3.bf16.msra.mxu0 %v1053_v17  ;;  %v1089_v52 = vld [vmem:[#allocation5 + $0x138] sm:$0xff]   ;;  %v1094_v56 = vld [vmem:[#allocation7 + $0x8] sm:$0xff]   ;;  %v1095_v57 = vld [vmem:[#allocation7 + $0x10] sm:$0xff]  }
  0x4a   :  { %939 = vmatprep.subr.bf16.mxu0 %v1056_v20  ;;  %v1090_v53 = vld [vmem:[#allocation2 + $0x10] ss:$24 sps:$4 sm:$0xff]   ;;  %v1098_v60 = vld [vmem:[#allocation7 + $0x28] sm:$0xff]   ;;  %v1099_v61 = vld [vmem:[#allocation7 + $0x30] sm:$0xff]  }
  0x4b   :  { %960 = vmatpush3.bf16.msra.mxu1 %v1055_v19  ;;  %v1096_v58 = vld [vmem:[#allocation7 + $0x18] sm:$0xff]   ;;  %v1097_v59 = vld [vmem:[#allocation7 + $0x20] sm:$0xff]   ;;  %v865_v0 = vld [vmem:[%s1352_s2] ss:$0 sm:$0xff] }
  0x4c   :  { %961 = vmatprep.subr.bf16.mxu1 %v1058_v22  ;;  %v1100_v62 = vld [vmem:[#allocation7 + $0x38] sm:$0xff]  }
  0x4d   :  { %940 = vmatpush3.bf16.msra.mxu0 %v1057_v21 }
  0x4e   :  { %941 = vmatprep.subr.bf16.mxu0 %v1060_v24 }
  0x4f   :  { %962 = vmatpush3.bf16.msra.mxu1 %v1059_v23 }
  0x50   :  { %963 = vmatprep.subr.bf16.mxu1 %v1062_v26 }
  0x51   :  { %942 = vmatpush3.bf16.msra.mxu0 %v1061_v25 }
  0x52   :  { %943 = vmatprep.subr.bf16.mxu0 %v1064_v28 }
  0x53   :  { %964 = vmatpush3.bf16.msra.mxu1 %v1063_v27  ;;  %v920_v27 = vld [vmem:[%s1354_s4] ss:$0 sm:$0xff]  ;;  %s1212_s4 = smov [#allocation8]  }
  0x54   :  { %965 = vmatprep.subr.bf16.mxu1 %v1066_v30  ;;  %s852_s8 = sshll.u32 %s1212_s4, 4  ;;  %s853_s8 = int_to_ptr.vmem [resolvable:$true] %s852_s8 }
  0x55   :  { %944 = vmatpush3.bf16.msra.mxu0 %v1065_v29  ;;  %s1175_s9 = scalar_lea.vmem %s853_s8, 256  ;;  %p1180_p11 = scmp.lt.s32.totalorder %s853_s8, %s853_s8 }
  0x56   :  { %973 = vmatprep.subr.bf16.mxu0 %v1071_v34  ;;  %p1176_p10 = scmp.ne.s32.totalorder %s853_s8, %s1175_s9  ;;  %p1181_p12 = scmp.lt.s32.totalorder %s1175_s9, %s1175_s9 }
  0x57   :  { %966 = vmatpush3.bf16.msra.mxu1 %v1070_v33 }
  0x58   :  { %523 = vmatmul.mubr.bf16.vlgmr.msra.gmra.mrb[0].mxu0 %v1067_v31  ;;  %1004 = vmatprep.subr.bf16.mxu1 %v1210_v55  ;;  %p1182_p13 = por %p1181_p12, %p1180_p11 }
  0x59   :  { %974 = vmatpush3.bf16.msra.mxu0 %v1075_v37  ;;  %604 = vmatprep.mubr.bf16.mxu0 %v1092_v47 }
  0x5a   :  { %564 = vmatmul.mubr.bf16.vlgmr.msra.gmra.mrb[0].mxu1 %v1072_v35  ;;  %975 = vmatprep.subr.bf16.mxu0 %v1076_v38  ;;  %p1183_p0 = pnand %p1182_p13, %p1176_p10 }
  0x5b   :  { %1005 = vmatpush3.bf16.msra.mxu1 %v1093_v54  ;;  %1020 = vmatprep.mubr.msk.bf16.mxu1 %vm1211_vm0, %v1210_v55 }
  0x5c   :  { %1006 = vmatprep.subr.bf16.mxu1 %v1210_v55 }
  0x5d   :  { %976 = vmatpush3.bf16.msra.mxu0 %v1077_v39  ;;  %v744_v39 = vlaneseq }
  0x5e   :  { %977 = vmatprep.subr.bf16.mxu0 %v1078_v40 }
  0x5f   :  { %1007 = vmatpush3.bf16.msra.mxu1 %v1094_v56 }
  0x60   :  { %1008 = vmatprep.subr.bf16.mxu1 %v1210_v55 }
  0x61   :  { %978 = vmatpush3.bf16.msra.mxu0 %v1079_v41  ;;  %v1293_v41 = vand.u32 127, %v744_v39 }
  0x62   :  { %979 = vmatprep.subr.bf16.mxu0 %v1080_v42 }
  0x63   :  { %1009 = vmatpush3.bf16.msra.mxu1 %v1095_v57  ;;  %vm746_vm1 = vcmp.lt.s32.totalorder %v1293_v41, 8  ;;  %vm834_vm12 = vcmp.eq.s32.totalorder %v1293_v41, 3  ;;  %vm831_vm13 = vcmp.eq.s32.totalorder %v1293_v41, 2  ;;  %vm830_vm14 = vcmp.eq.s32.totalorder %v1293_v41, 1 }
  0x64   :  { %1010 = vmatprep.subr.bf16.mxu1 %v1210_v55  ;;  %vm829_vm15 = vcmp.eq.s32.totalorder %v1293_v41, 0 }
  0x65   :  { %980 = vmatpush3.bf16.msra.mxu0 %v1081_v43 }
  0x66   :  { %981 = vmatprep.subr.bf16.mxu0 %v1082_v44 }
  0x67   :  { %1011 = vmatpush3.bf16.msra.mxu1 %v1096_v58 }
  0x68   :  { %1012 = vmatprep.subr.bf16.mxu1 %v1210_v55 }
  0x69   :  { %982 = vmatpush3.bf16.msra.mxu0 %v1083_v45 }
  0x6a   :  { %983 = vmatprep.subr.bf16.mxu0 %v1084_v46 }
  0x6b   :  { %1013 = vmatpush3.bf16.msra.mxu1 %v1097_v59 }
  0x6c   :  { %1014 = vmatprep.subr.bf16.mxu1 %v1210_v55 }
  0x6d   :  { %984 = vmatpush3.bf16.msra.mxu0 %v1085_v48 }
  0x6e   :  { %985 = vmatprep.subr.bf16.mxu0 %v1086_v49 }
  0x6f   :  { %1015 = vmatpush3.bf16.msra.mxu1 %v1098_v60 }
  0x70   :  { %1016 = vmatprep.subr.bf16.mxu1 %v1210_v55 }
  0x71   :  { %986 = vmatpush3.bf16.msra.mxu0 %v1087_v50 }
  0x72   :  { %987 = vmatprep.subr.bf16.mxu0 %v1088_v51 }
  0x73   :  { %1017 = vmatpush3.bf16.msra.mxu1 %v1099_v61 }
  0x74   :  { %1018 = vmatprep.subr.bf16.mxu1 %v1210_v55 }
  0x75   :  { %988 = vmatpush3.bf16.msra.mxu0 %v1089_v52 }
  0x77   :  { %1019 = vmatpush3.bf16.msra.mxu1 %v1100_v62 }
  0x78   :  { %605 = vmatmul.mubr.bf16.vlgmr.msra.gmra.mrb[4].mxu0 %v1090_v53 }
 0x12b   :  { %v945_v63 = vpop.f32.mrb[0].mxu0 }
 0x12c   :  { %v946_v1 = vpop.f32.mrb[1].mxu0 }
 0x12d   :  { %v947_v2 = vadd.f32 %v946_v1, %v945_v63  ;;  %v948_v3 = vpop.f32.mrb[2].mxu0  ;;  %v967_v4 = vpop.f32.mrb[0].mxu1 }
 0x12e   :  { %v949_v5 = vpop.f32.mrb[3].mxu0  ;;  %v968_v8 = vpop.f32.mrb[1].mxu1 }
 0x12f   :  { %v525_v6 = vadd.f32 %v947_v2, %v865_v0  ;;  %v950_v7 = vadd.f32 %v949_v5, %v948_v3  ;;  %v969_v9 = vadd.f32 %v968_v8, %v967_v4  ;;  %v970_v10 = vpop.f32.mrb[2].mxu1 }
 0x130   :  { %v971_v12 = vpop.f32.mrb[3].mxu1 }
 0x131   :  { %v528_v11 = vadd.f32 %v950_v7, %v865_v0  ;;  %v566_v13 = vadd.f32 %v969_v9, %v525_v6  ;;  %v972_v14 = vadd.f32 %v971_v12, %v970_v10 }
 0x133   :  { %v569_v15 = vadd.f32 %v972_v14, %v528_v11 }
 0x14b   :  { %v989_v16 = vpop.f32.mrb[4].mxu0 }
 0x14c   :  { %v990_v17 = vpop.f32.mrb[5].mxu0 }
 0x14d   :  { %v991_v18 = vadd.f32 %v990_v17, %v989_v16  ;;  %v992_v19 = vpop.f32.mrb[6].mxu0 }
 0x14e   :  { %v993_v20 = vpop.f32.mrb[7].mxu0 }
 0x14f   :  { %v607_v21 = vadd.f32 %v991_v18, %v566_v13  ;;  %v994_v22 = vadd.f32 %v993_v20, %v992_v19 }
 0x151   :  { %v610_v23 = vadd.f32 %v994_v22, %v569_v15  ;;  %v613_v24 = vmax.f32 %v607_v21, 0.0 }
 0x153   :  { %v614_v25 = vmax.f32 %v610_v23, 0.0 }
 0x155   :  { %v615_v26 = vpack.c.bf16 %v614_v25, %v613_v24 }
 0x157   :  { %1021 = vmatmul.mubr.bf16.vlgmr.msra.gmra.mrb[4].mxu1 %v615_v26 }
 0x22a   :  { %v721_v28 = vpop.f32.mrb[4].mxu1 }
 0x22b   :  { %v722_v29 = vadd.f32 %v920_v27, %v721_v28  ;;  %v1022_v30 = vpop.f32.mrb[5].mxu1 }
 0x22c   :  { %v724_v31 = vpop.f32.mrb[6].mxu1 }
 0x22d   :  { %728 = vmax.xlane.f32.xlu0 %v722_v29  ;;  %v1023_v32 = vpop.f32.mrb[7].mxu1  ;;  %v725_v33 = vadd.f32 %v920_v27, %v724_v31 }
 0x231   :  { %730 = vmax.xlane.f32.xlu0 %v725_v33 }
 0x2ba   :  { %v729_v34 = vpop.xlane.xlu0 %728 }
 0x2bb   :  { %v732_v35 = vsub.f32 %v722_v29, %v729_v34 }
 0x2bd   :  { %v734_v36 = vmul.f32 1.442695, %v732_v35 }
 0x2be   :  { %v731_v37 = vpop.xlane.xlu0 %730 }
 0x2bf   :  { %1101 = vpow2.f32 %v734_v36  ;;  %v733_v38 = vsub.f32 %v725_v33, %v731_v37 }
 0x2c1   :  { %v736_v40 = vmul.f32 1.442695, %v733_v38 }
 0x2c3   :  { %1103 = vpow2.f32 %v736_v40 }
 0x2c9   :  { %v1102_v42 = vpop.eup %1101 }
 0x2ca   :  { %v747_v43 = vsel %vm746_vm1, %v1102_v42, -1.0 }
 0x2cb   :  { %749 = vmax.xlane.f32.xlu1 %v747_v43 }
 0x2cd   :  { %v1104_v44 = vpop.eup %1103 }
 0x2ce   :  { %v748_v45 = vsel %vm746_vm1, %v1104_v44, -1.0 }
 0x2cf   :  { %751 = vmax.xlane.f32.xlu1 %v748_v45 }
 0x358   :  { %v1296_v46 = vpop.xlane.xlu1 %749 }
 0x359   :  { %vm753_vm2 = vcmp.eq.f32.partialorder %v747_v43, %v1296_v46 }
 0x35a   :  { %v755_v47 = vsel %vm753_vm2, %v1293_v41, 128 }
 0x35b   :  { %v758_v48 = vshra.s32 %v755_v47, 16  ;;  %v757_v54 = vand.u32 65535, %v755_v47 }
 0x35c   :  { %v1300_v49 = vpop.xlane.xlu1 %751 }
 0x35d   :  { %vm754_vm3 = vcmp.eq.f32.partialorder %v748_v45, %v1300_v49  ;;  %v760_v50 = vcvt.s32.f32 %v758_v48  ;;  %v759_v56 = vcvt.s32.f32 %v757_v54 }
 0x35e   :  { %v756_v51 = vsel %vm754_vm3, %v1293_v41, 128 }
 0x35f   :  { %761 = vmin.xlane.f32.xlu0 %v760_v50  ;;  %v772_v52 = vshra.s32 %v756_v51, 16  ;;  %v771_v57 = vand.u32 65535, %v756_v51 }
 0x361   :  { %v774_v53 = vcvt.s32.f32 %v772_v52  ;;  %v773_v60 = vcvt.s32.f32 %v771_v57 }
 0x363   :  { %775 = vmin.xlane.f32.xlu1 %v774_v53 }
 0x3ec   :  { %v762_v55 = vpop.xlane.xlu0 %761 }
 0x3ed   :  { %vm763_vm4 = vcmp.eq.f32.partialorder %v760_v50, %v762_v55  ;;  %v768_v62 = vcvt.f32.s32 %v762_v55 }
 0x3ee   :  { %v764_v58 = vsel %vm763_vm4, %v759_v56, inf }
 0x3ef   :  { %765 = vmin.xlane.f32.xlu0 %v764_v58  ;;  %v769_v0 = vshll.u32 %v768_v62, 16 }
 0x3f0   :  { %v776_v59 = vpop.xlane.xlu1 %775 }
 0x3f1   :  { %vm777_vm5 = vcmp.eq.f32.partialorder %v774_v53, %v776_v59  ;;  %v782_v1 = vcvt.f32.s32 %v776_v59 }
 0x3f2   :  { %v778_v61 = vsel %vm777_vm5, %v773_v60, inf }
 0x3f3   :  { %779 = vmin.xlane.f32.xlu1 %v778_v61  ;;  %v783_v5 = vshll.u32 %v782_v1, 16 }
 0x47c   :  { %v766_v63 = vpop.xlane.xlu0 %765 }
 0x47d   :  { %v767_v2 = vcvt.f32.s32 %v766_v63 }
 0x47f   :  { %v1304_v3 = vadd.s32 %v769_v0, %v767_v2 }
 0x480   :  { %v780_v4 = vpop.xlane.xlu1 %779 }
 0x481   :  { %v781_v6 = vcvt.f32.s32 %v780_v4  ;;  %vm785_vm6 = vcmp.eq.s32.totalorder %v1293_v41, %v1304_v3  ;;  %v832_v39 = vcvt.s32.f32 %v1304_v3 }
 0x482   :  { %v787_v7 = vsel %vm785_vm6, -1.0, %v747_v43 }
 0x483   :  { %v1308_v8 = vadd.s32 %v783_v5, %v781_v6  ;;  %789 = vmax.xlane.f32.xlu0 %v787_v7 }
 0x485   :  { %vm786_vm7 = vcmp.eq.s32.totalorder %v1293_v41, %v1308_v8  ;;  %v833_v51 = vcvt.s32.f32 %v1308_v8 }
 0x486   :  { %v788_v9 = vsel %vm786_vm7, -1.0, %v748_v45 }
 0x487   :  { %791 = vmax.xlane.f32.xlu1 %v788_v9 }
 0x510   :  { %v790_v10 = vpop.xlane.xlu0 %789 }
 0x511   :  { %vm793_vm8 = vcmp.eq.f32.partialorder %v787_v7, %v790_v10 }
 0x512   :  { %v795_v11 = vsel %vm793_vm8, %v1293_v41, 128 }
 0x513   :  { %v798_v12 = vshra.s32 %v795_v11, 16  ;;  %v797_v18 = vand.u32 65535, %v795_v11 }
 0x514   :  { %v792_v13 = vpop.xlane.xlu1 %791 }
 0x515   :  { %vm794_vm9 = vcmp.eq.f32.partialorder %v788_v9, %v792_v13  ;;  %v800_v14 = vcvt.s32.f32 %v798_v12  ;;  %v799_v20 = vcvt.s32.f32 %v797_v18 }
 0x516   :  { %v796_v15 = vsel %vm794_vm9, %v1293_v41, 128 }
 0x517   :  { %801 = vmin.xlane.f32.xlu0 %v800_v14  ;;  %v812_v16 = vshra.s32 %v796_v15, 16  ;;  %v811_v21 = vand.u32 65535, %v796_v15 }
 0x519   :  { %v814_v17 = vcvt.s32.f32 %v812_v16  ;;  %v813_v24 = vcvt.s32.f32 %v811_v21 }
 0x51b   :  { %815 = vmin.xlane.f32.xlu1 %v814_v17  ;;  %738 = vadd.xlane.f32.xlu0 %v1102_v42 }
 0x51f   :  { %740 = vadd.xlane.f32.xlu1 %v1104_v44 }
 0x5a4   :  { %v802_v19 = vpop.xlane.xlu0 %801 }
 0x5a5   :  { %vm803_vm10 = vcmp.eq.f32.partialorder %v800_v14, %v802_v19  ;;  %v808_v28 = vcvt.f32.s32 %v802_v19 }
 0x5a6   :  { %v804_v22 = vsel %vm803_vm10, %v799_v20, inf }
 0x5a7   :  { %805 = vmin.xlane.f32.xlu0 %v804_v22  ;;  %v809_v30 = vshll.u32 %v808_v28, 16 }
 0x5a8   :  { %v816_v23 = vpop.xlane.xlu1 %815  ;;  %v739_v26 = vpop.xlane.xlu0 %738 }
 0x5a9   :  { %vm817_vm11 = vcmp.eq.f32.partialorder %v814_v17, %v816_v23  ;;  %1105 = vrcp.f32 %v739_v26  ;;  %v822_v31 = vcvt.f32.s32 %v816_v23 }
 0x5aa   :  { %v818_v25 = vsel %vm817_vm11, %v813_v24, inf }
 0x5ab   :  { %819 = vmin.xlane.f32.xlu1 %v818_v25  ;;  %v823_v36 = vshll.u32 %v822_v31, 16 }
 0x5ac   :  { %v741_v27 = vpop.xlane.xlu1 %740 }
 0x5ad   :  { %1107 = vrcp.f32 %v741_v27 }
 0x5b3   :  { %v1106_v34 = vpop.eup %1105 }
 0x5b4   :  { %v827_v40 = vmul.f32 %v1106_v34, %v790_v10  ;;  %v825_v45 = vmul.f32 %v1106_v34, %v1296_v46 }
 0x5b7   :  { %v1108_v44 = vpop.eup %1107 }
 0x5b8   :  { %v828_v53 = vmul.f32 %v1108_v44, %v792_v13  ;;  %v826_v46 = vmul.f32 %v1108_v44, %v1300_v49 }
 0x634   :  { %v806_v29 = vpop.xlane.xlu0 %805 }
 0x635   :  { %v807_v32 = vcvt.f32.s32 %v806_v29 }
 0x637   :  { %v810_v33 = vadd.s32 %v809_v30, %v807_v32 }
 0x638   :  { %v820_v35 = vpop.xlane.xlu1 %819 }
 0x639   :  { %v835_v37 = vcvt.s32.f32 %v810_v33  ;;  %v821_v38 = vcvt.f32.s32 %v820_v35 }
 0x63b   :  { %v837_v42 = vsel %vm834_vm12, %v835_v37, 0.0  ;;  %v824_v43 = vadd.s32 %v823_v36, %v821_v38 }
 0x63c   :  { %v839_v47 = vsel %vm831_vm13, %v832_v39, %v837_v42 }
 0x63d   :  { %v841_v48 = vsel %vm830_vm14, %v827_v40, %v839_v47  ;;  %v836_v50 = vcvt.s32.f32 %v824_v43 }
 0x63e   :  { %v843_v52 = vsel %vm829_vm15, %v825_v45, %v841_v48 }
 0x63f   :  { %v838_v54 = vsel %vm834_vm12, %v836_v50, 0.0  ;;  %845 = vst [vmem:[#allocation8] sm:$0xff] %v843_v52 }
 0x640   :  { %v840_v55 = vsel %vm831_vm13, %v833_v51, %v838_v54 }
 0x641   :  { %v842_v56 = vsel %vm830_vm14, %v828_v53, %v840_v55 }
 0x642   :  { %v844_v57 = vsel %vm829_vm15, %v826_v46, %v842_v56 }
 0x643   :  { %846 = vst [vmem:[#allocation8 + $0x8] sm:$0xff] %v844_v57 }
 0x644   :  { %1186 = shalt.err (!%p1183_p0)
}
 0x645   :  { %s1187_s12 = scalar_lea.hbm %s1355_s5, 256 }
 0x646   :  { %p1188_p1 = scmp.ne.s32.totalorder %s1355_s5, %s1187_s12  ;;  %p1191_p2 = scmp.lt.u32.totalorder %s1187_s12, %s1355_s5 }
 0x648   :  { %p1193_p3 = pnand %p1191_p2, %p1188_p1 }
 0x64a   :  { %1196 = shalt.err (!%p1193_p3)
}
 0x64b   :  { %s1213_s1 = smov 128   ;;  %s1214_s17 = smov 8  }
 0x64c   :  { %858 = dma.vmem_to_hbm [thread:$0]  %s853_s8, 256, %s1355_s5, [#allocation4], %s1213_s1, %s1213_s1, %s1214_s17  }
 0x64d   :  { %1201 = dma.done.wait [#allocation4], 256  }
 0x64e   :  { %1202 = vsyncadd [#allocation4], 4294967040 }
 0x64f   :  { %862 = vsyncpa [#allocation3], 1 }
 0x650   :  { %863 = vsyncpa [#allocation6], 1 }
 0x651   :  { %864 = vsyncpa [#allocation4], 1 }

</bundles_post_ra>
